<compile_context>
chip_gen: v7x
topology: tpu7x:2x2x1
jax: 0.10.0
libtpu: 0.0.40
codegen_flags: <defaults>
</compile_context>

<pallas_src>
import functools
import math

import jax
import jax.numpy as jnp
from jax.experimental import pallas as pl
from jax.experimental.pallas import tpu as pltpu


# ----------------------------- buffer construction (module __init__) ---------
def build_positional_encoding(d_model: int, max_len: int = 5000) -> jnp.ndarray:
    """Faithful to PositionalEncoding.__init__: returns pe of shape [max_len, 1, d_model]."""
    position = jnp.arange(max_len, dtype=jnp.float32)[:, None]           # [max_len, 1]
    div_term = jnp.exp(jnp.arange(0, d_model, 2, dtype=jnp.float32)
                       * (-math.log(10000.0) / d_model))                 # [d_model // 2]
    angles = position * div_term                                         # [max_len, d_model // 2]
    pe = jnp.zeros((max_len, 1, d_model), jnp.float32)
    pe = pe.at[:, 0, 0::2].set(jnp.sin(angles))
    pe = pe.at[:, 0, 1::2].set(jnp.cos(angles))
    return pe


# ----------------------------- kernel ----------------------------------------
def _pe_add_kernel(x_ref, pe_ref, o_ref, *, batch: int):
    # x_ref / o_ref: [TS, B*D] lane-dense blocks; pe_ref: [TS, D].
    # Broadcast pe over the batch by tiling it along the lane axis so the
    # add + store happen on one dense [TS, B*D] slab.
    pe = pe_ref[...]
    if batch > 1:
        pe = jnp.concatenate([pe] * batch, axis=1)       # [TS, B*D]
    o_ref[...] = x_ref[...] + pe
    # TODO(synk): nn.Dropout(p=0.1) is identity in eval mode; training-mode
    # dropout (PRNG mask + 1/(1-p) scaling) is not implemented here.


# ----------------------------- tiling heuristic --------------------------------
def _choose_seq_tile(S: int, B: int, D: int, itemsize: int,
                     block_budget_bytes: int = 8 << 20) -> int:
    # Resident per seq row: double-buffered x block + out block + pe block.
    row_bytes = itemsize * (2 * B * D + 2 * B * D + 2 * D)
    ts = max(block_budget_bytes // row_bytes, 1)
    if S >= 16:
        # Keep >= 2 grid steps so v7x's second TensorCore gets work.
        ts = min(ts, (S + 1) // 2)
    ts = min(ts, S)
    if ts < S:
        # Sub-full seq blocks must respect the sublane multiple of 8.
        ts = max((ts // 8) * 8, 8)
        ts = min(ts, S)
    return int(ts)


# ----------------------------- wrapper ----------------------------------------
def positional_encoding_forward(x: jnp.ndarray, pe: jnp.ndarray) -> jnp.ndarray:
    """x: [S, B, D]; pe: [max_len, 1, D] float32.  Returns x + pe[:S] (dropout=identity)."""
    S, B, D = x.shape
    assert S <= pe.shape[0], "sequence longer than the positional-encoding buffer"

    x2 = x.reshape(S, B * D)                         # free row-major view, lane-dense
    pe2 = jnp.squeeze(pe, axis=1).astype(x.dtype)    # [max_len, D]; blocks picked by index_map

    TS = _choose_seq_tile(S, B, D, x.dtype.itemsize)
    grid = (pl.cdiv(S, TS),)

    out = pl.pallas_call(
        functools.partial(_pe_add_kernel, batch=B),
        out_shape=jax.ShapeDtypeStruct((S, B * D), x.dtype),
        grid_spec=pltpu.PrefetchScalarGridSpec(
            num_scalar_prefetch=0,
            grid=grid,
            in_specs=[pl.BlockSpec((TS, B * D), lambda i: (i, 0)),
                      pl.BlockSpec((TS, D), lambda i: (i, 0))],
            out_specs=pl.BlockSpec((TS, B * D), lambda i: (i, 0)),
        ),
        compiler_params=pltpu.CompilerParams(
            dimension_semantics=("parallel",),
            vmem_limit_bytes=32 * 1024 * 1024,
        ),
    )(x2, pe2)
    return out.reshape(S, B, D)


# ----------------------------- demo / self-check ------------------------------
if __name__ == "__main__":
    key = jax.random.PRNGKey(0)

    S, B, D = 8, 2, 32            # seq_len, batch_size, d_model (even, as the module requires)
    x = jax.random.normal(key, (S, B, D), jnp.float32)
    pe = build_positional_encoding(D, max_len=5000)

    out = jax.block_until_ready(positional_encoding_forward(x, pe))
    ref = x + pe[:S]              # pure-JAX reference (dropout = identity in eval)
    assert out.shape == (S, B, D), out.shape
    assert bool(jnp.all(jnp.isfinite(out)))
    assert bool(jnp.allclose(out, ref, atol=1e-6, rtol=1e-6))

    # Exercise a multi-step grid with a partial last seq block.
    S2 = 40
    x_big = jax.random.normal(jax.random.PRNGKey(1), (S2, B, D), jnp.float32)
    out_big = jax.block_until_ready(positional_encoding_forward(x_big, pe))
    assert bool(jnp.allclose(out_big, x_big + pe[:S2], atol=1e-6, rtol=1e-6))

    print("KERNEL_OK")
</pallas_src>

<mosaic_0001>
module attributes {stable_mosaic.version = 11 : i64} {
  func.func @_pe_add_kernel(%arg0: i32, %arg1: memref<8x64xf32, #tpu.memory_space<vmem>>, %arg2: memref<8x32xf32, #tpu.memory_space<vmem>>, %arg3: memref<8x64xf32, #tpu.memory_space<vmem>>) attributes {dimension_semantics = [#tpu.dimension_semantics<parallel>], iteration_bounds = array<i64: 1>, scalar_prefetch = 0 : i64, scratch_operands = 0 : i64, tpu.core_type = #tpu.core_type<tc>, window_params = [{transform_indices = @transform_0, window_bounds = array<i64: 8, 64>}, {transform_indices = @transform_1, window_bounds = array<i64: 8, 32>}, {transform_indices = @transform_2, window_bounds = array<i64: 8, 64>}]} {
    %c0 = arith.constant 0 : index
    %c0_0 = arith.constant 0 : index
    %0 = vector.load %arg2[%c0, %c0_0] : memref<8x32xf32, #tpu.memory_space<vmem>>, vector<8x32xf32>
    %1 = tpu.concatenate %0, %0 in 1 : vector<8x32xf32>, vector<8x32xf32> -> vector<8x64xf32>
    %c0_1 = arith.constant 0 : index
    %c0_2 = arith.constant 0 : index
    %2 = vector.load %arg1[%c0_1, %c0_2] : memref<8x64xf32, #tpu.memory_space<vmem>>, vector<8x64xf32>
    %3 = arith.addf %2, %1 : vector<8x64xf32>
    %c0_3 = arith.constant 0 : index
    %c0_4 = arith.constant 0 : index
    %4 = vector.load %arg3[%c0_3, %c0_4] : memref<8x64xf32, #tpu.memory_space<vmem>>, vector<8x64xf32>
    tpu.vector_store %arg3[%c0_3, %c0_4], %3 {strides = array<i32>} : memref<8x64xf32, #tpu.memory_space<vmem>>, vector<8x64xf32>,
    return
  }
  func.func @transform_0(%arg0: i32) -> (i32, i32) {
    %c0_i32 = arith.constant 0 : i32
    %c0_i32_0 = arith.constant 0 : i32
    return %arg0, %c0_i32 : i32, i32
  }
  func.func @transform_1(%arg0: i32) -> (i32, i32) {
    %c0_i32 = arith.constant 0 : i32
    %c0_i32_0 = arith.constant 0 : i32
    return %arg0, %c0_i32 : i32, i32
  }
  func.func @transform_2(%arg0: i32) -> (i32, i32) {
    %c0_i32 = arith.constant 0 : i32
    %c0_i32_0 = arith.constant 0 : i32
    return %arg0, %c0_i32 : i32, i32
  }
}

</mosaic_0001>

<bundles_post_ra>
// kernel: tpu_custom_call.1
= control target key start
LH: loop header
LB: loop body
LE: loop exit
PB: predicated region body
PF: predicated region fallthrough
CT: control target
= control target key end

     0   :  { %s98_s0 = inlined_call_operand.vmem [shape: f32[8,64], index: 0, kind: input, shape index: {}]   ;;  %s99_s1 = inlined_call_operand.vmem [shape: f32[5000,32], index: 1, kind: input, shape index: {}]   ;;  %s100_s2 = inlined_call_operand.hbm [shape: f32[8,64], index: 2, kind: output, shape index: {}]  }
   0x1   :  { %v12_v0 = vld [vmem:[%s99_s1] sm:$0xff] }
   0x2   :  { %7 = vsyncpa [#allocation3], 0  ;;  %s63_s11 = smov 32   ;;  %vm17_vm0 = vcmask 261120   ;;  %v19_v1 = vld [vmem:[%s98_s0] sm:$0xff]  ;;  %s64_s14 = smov [#allocation2]  }
   0x3   :  { %14 = vrot.lane.b32.xlu0 %v12_v0, %s63_s11  ;;  %s29_s15 = sshll.u32 %s64_s14, 4  ;;  %vm21_vm1 = vcmask 523264   ;;  %s30_s15 = int_to_ptr.vmem [resolvable:$true] %s29_s15 }
   0x4   :  { %s39_s16 = scalar_lea.vmem %s30_s15, 128  ;;  %p44_p1 = scmp.lt.s32.totalorder %s30_s15, %s30_s15 }
   0x5   :  { %p40_p0 = scmp.ne.s32.totalorder %s30_s15, %s39_s16  ;;  %p45_p2 = scmp.lt.s32.totalorder %s39_s16, %s39_s16 }
   0x7   :  { %p46_p3 = por %p45_p2, %p44_p1 }
   0x9   :  { %p47_p4 = pnand %p46_p3, %p40_p0 }
  0x75   :  { %v15_v2 = vpop.permute.xlu0 %14 }
  0x76   :  { %v18_v3 = vsel %vm17_vm0, %v12_v0, %v15_v2 }
  0x77   :  { %v20_v4 = vadd.f32 %v19_v1, %v18_v3 }
  0x79   :  { %22 = vst.msk [vmem:[#allocation2] sm:$0xff] %vm21_vm1, %v20_v4 }
  0x7a   :  { %50 = shalt.err (!%p47_p4)
}
  0x7b   :  { %s51_s18 = scalar_lea.hbm %s100_s2, 128 }
  0x7c   :  { %p52_p5 = scmp.ne.s32.totalorder %s100_s2, %s51_s18  ;;  %p55_p6 = scmp.lt.u32.totalorder %s51_s18, %s100_s2 }
  0x7e   :  { %p57_p7 = pnand %p55_p6, %p52_p5 }
  0x80   :  { %60 = shalt.err (!%p57_p7)
}
  0x81   :  { %32 = dma.vmem_to_hbm [thread:$0]  %s30_s15, 128, %s100_s2, [#allocation3]  }
  0x82   :  { %61 = dma.done.wait [#allocation3], 128  }
  0x83   :  { %62 = vsyncadd [#allocation3], 4294967168 }
  0x84   :  { %36 = vsyncpa [#allocation3], 1 }

</bundles_post_ra>
